<compile_context>
chip_gen: v6e
topology: v6e:2x2x1
jax: 0.10.0
libtpu: 0.0.40
codegen_flags: <defaults>
</compile_context>

<pallas_src>
import numpy as np
import jax
import jax.numpy as jnp
from jax.experimental import pallas as pl
from jax.experimental.pallas import tpu as pltpu


def bert_pool_kernel(hid_ref, pool_ref, scale_ref, out_ref):
    # hid_ref   : (Kb, Hb) bf16 — rows of the flattened (L*S, H) hidden slab
    # pool_ref  : (Wp, Kb) bf16 — 0/1 sub-token membership (CLS row fused in),
    #                             layer-tiled so the 12-layer sum is inside K
    # scale_ref : (Wp, 1)  f32  — per-row 1/count (mean) factors
    # out_ref   : (Wp, Hb) f32  — block index invariant along K -> resident,
    #                             doubles as the accumulator (no scratch)
    k = pl.program_id(2)

    @pl.when(k == 0)
    def _init():
        out_ref[...] = jnp.zeros_like(out_ref)

    # MXU matmul: pooling (sum over sub-token positions AND layers) for this
    # K block, accumulated in f32 directly in the resident output block.
    out_ref[...] += jnp.dot(pool_ref[...], hid_ref[...],
                            preferred_element_type=jnp.float32)

    @pl.when(k == pl.num_programs(2) - 1)
    def _flush():
        out_ref[...] *= scale_ref[...]


def _round_up(x, m):
    return ((x + m - 1) // m) * m


def _pick_hb(H, B):
    """Split H across the two v7x TensorCores only when batch alone can't
    ('parallel' on B needs B >= 2 and even). Hb must be a multiple of 128."""
    if B % 2 == 0 or H % 256 != 0:
        return H
    return H // 2


def _pick_kb(K, Hb, itemsize, target_bytes):
    """Largest K block whose bf16 hidden tile is <= target_bytes.  Kb must be a
    multiple of 128 (it is the lane dim of the pool block and the sublane dim
    of the hidden block) or equal to the full K extent."""
    if K * Hb * itemsize <= target_bytes:
        return K
    best = None
    kb = 128
    while kb <= K:
        if K % kb == 0 and kb * Hb * itemsize <= target_bytes:
            best = kb
        kb += 128
    return best if best is not None else K


def bert_embedder_pallas(hidden_states_bf16, pool_sum, pool_scale, max_length,
                         *, target_block_bytes=4 << 20):
    """hidden_states_bf16: (B, L, S, H) bf16 stand-in for hidden_states[1:13].
    pool_sum: (B, Wp, L*S) bf16 0/1 matrix; rows 0..max_length-1 = words,
    row max_length = CLS aggregation, remaining rows = padding (zeros).
    pool_scale: (B, Wp, 1) f32 per-row mean factors.
    Returns (embeddings (B, max_length, H), CLS (B, H)), both f32."""
    B, L, S, H = hidden_states_bf16.shape
    Wp = pool_sum.shape[1]
    K = L * S
    assert pool_sum.shape == (B, Wp, K)
    assert pool_scale.shape == (B, Wp, 1)

    # Free, contiguous reshape: fold the layer axis into the contraction.
    hidden_flat = hidden_states_bf16.reshape(B, K, H)

    Hb = _pick_hb(H, B)
    Kb = _pick_kb(K, Hb, hidden_flat.dtype.itemsize, target_block_bytes)
    nH = H // Hb
    nK = K // Kb

    # Rough per-step VMEM footprint (double-buffered inputs + resident out);
    # raise the scoped limit only if we exceed the v5e 16 MiB default.
    est = 2 * (Kb * Hb * 2 + Wp * Kb * 2) + Wp * Hb * 4 + Wp * 4
    cp_kwargs = dict(dimension_semantics=("parallel", "parallel", "arbitrary"))
    if est > (16 << 20):
        cp_kwargs["vmem_limit_bytes"] = min(64 << 20, 2 * est)

    out = pl.pallas_call(
        bert_pool_kernel,
        out_shape=jax.ShapeDtypeStruct((B, Wp, H), jnp.float32),
        grid_spec=pltpu.PrefetchScalarGridSpec(
            num_scalar_prefetch=0,
            grid=(B, nH, nK),
            in_specs=[
                # one (Kb, Hb) slab of the flattened hidden stream per step
                pl.BlockSpec((None, Kb, Hb), lambda b, h, k: (b, k, h)),
                # pooling matrix block follows K; index_map independent of h
                pl.BlockSpec((None, Wp, Kb), lambda b, h, k: (b, 0, k)),
                # per-row mean scales: fully resident per batch item
                pl.BlockSpec((None, Wp, 1), lambda b, h, k: (b, 0, 0)),
            ],
            # output block index invariant along k -> resident accumulator
            out_specs=pl.BlockSpec((None, Wp, Hb), lambda b, h, k: (b, 0, h)),
        ),
        compiler_params=pltpu.CompilerParams(**cp_kwargs),
    )(hidden_flat, pool_sum, pool_scale)

    embeddings = out[:, :max_length, :]
    cls = out[:, max_length, :]
    return embeddings, cls


def build_pool_matrices(word_lengths, max_length, seq_len, num_layers,
                        grp_type="mean"):
    """Glue: per-word sub-token counts (sub_tokens_map) -> 0/1 membership
    matrix (bf16, exact) + per-row mean scales (f32). Position 0 is [CLS],
    sub-tokens occupy 1..total, total+1 is [SEP], rest is padding. Words beyond
    the real word count keep all-zero rows -> zero-padding to max_length.
    Row `max_length` is the fused CLS-aggregation row. The (Wp, S) layer
    pattern is tiled to (Wp, L*S) so the layer sum is part of the matmul."""
    B = len(word_lengths)
    Wp = _round_up(max_length + 1, 16)   # bf16 LHS: 16 sublanes per vreg
    psum = np.zeros((B, Wp, seq_len), np.float32)
    scale = np.zeros((B, Wp, 1), np.float32)
    for b, lens in enumerate(word_lengths):
        total = int(sum(lens))
        assert all(l > 0 for l in lens), "zero-length word in sub_tokens_map"
        assert total + 2 <= seq_len, "sub-tokens (+CLS/SEP) exceed seq length"
        assert len(lens) <= max_length, "more words than max_length"
        off = 1
        for w, ln in enumerate(lens):
            psum[b, w, off:off + ln] = 1.0
            scale[b, w, 0] = 1.0 / float(ln)
            off += ln
        if grp_type == "mean":
            psum[b, max_length, 0:total + 1] = 1.0      # CLS + all sub-tokens
            scale[b, max_length, 0] = 1.0 / float(total + 1)
        else:
            psum[b, max_length, 0] = 1.0                 # plain CLS
            scale[b, max_length, 0] = 1.0
    # Fold the num_layers sum into the contraction: repeat along the seq axis
    # so K = L*S matches the layer-major flattened hidden stream.
    psum = np.tile(psum, (1, 1, num_layers))
    return jnp.asarray(psum, jnp.bfloat16), jnp.asarray(scale, jnp.float32)


def reference(hidden_states_f32, word_lengths, max_length, grp_type="mean"):
    """Plain-numpy mirror of the torch forward's aggregation loops."""
    hs = np.asarray(hidden_states_f32, dtype=np.float32)
    B, L, S, H = hs.shape
    embs = np.zeros((B, max_length, H), np.float32)
    clss = np.zeros((B, H), np.float32)
    for b, lens in enumerate(word_lengths):
        total = int(sum(lens))
        sum_all = hs[b].sum(axis=0)                 # sum(hidden_states[1:13])[0]
        padding_length = S - total - 2
        if padding_length > 0:
            sum_all = sum_all[:-padding_length]
        cls = sum_all[0].copy()
        toks = sum_all[1:len(sum_all) - 1]          # drop CLS and SEP
        if grp_type == "mean":
            cls = (cls + toks.sum(axis=0)) / float(len(toks) + 1)
        idx = 0
        for w, ln in enumerate(lens):
            embs[b, w] = toks[idx:idx + ln].mean(axis=0)
            idx += ln
        clss[b] = cls
    return embs, clss


if __name__ == "__main__":
    # small shapes: B text-lists, 12 summed BERT layers, max_length=seq=16, hidden=128
    B, L, MAX_LENGTH, H = 2, 12, 16, 128
    S = MAX_LENGTH

    # deterministic "sub_tokens_map": sub-token count per word, per text list
    word_lengths = [[2, 1, 3, 1],   # 7 sub-tokens  (+CLS+SEP = 9 <= 16)
                    [1, 2, 2]]      # 5 sub-tokens

    key = jax.random.PRNGKey(0)
    # synthetic stand-in for bert_output.hidden_states[1:13] (layers x seq x hidden)
    hidden_states = jax.random.normal(key, (B, L, S, H), dtype=jnp.float32)
    # carry the big stream in bf16 (cast once "at the BERT output")
    hidden_bf16 = hidden_states.astype(jnp.bfloat16)

    pool_sum, pool_scale = build_pool_matrices(word_lengths, MAX_LENGTH, S, L, "mean")

    emb, cls = bert_embedder_pallas(hidden_bf16, pool_sum, pool_scale, MAX_LENGTH)
    emb = jax.block_until_ready(emb)
    cls = jax.block_until_ready(cls)

    # reference uses the same bf16-quantized hidden states (upcast to f32) so the
    # comparison isolates the kernel's aggregation math
    ref_emb, ref_cls = reference(np.asarray(hidden_bf16.astype(jnp.float32)),
                                 word_lengths, MAX_LENGTH, "mean")
    np.testing.assert_allclose(np.asarray(emb), ref_emb, rtol=1e-4, atol=1e-4)
    np.testing.assert_allclose(np.asarray(cls), ref_cls, rtol=1e-4, atol=1e-4)

    print("KERNEL_OK")
</pallas_src>

<mosaic_0001>
module attributes {stable_mosaic.version = 11 : i64} {
  func.func @bert_pool_kernel(%arg0: i32, %arg1: i32, %arg2: i32, %arg3: memref<1x192x128xbf16, #tpu.memory_space<vmem>>, %arg4: memref<1x32x192xbf16, #tpu.memory_space<vmem>>, %arg5: memref<1x32x1xf32, #tpu.memory_space<vmem>>, %arg6: memref<1x32x128xf32, #tpu.memory_space<vmem>>) attributes {dimension_semantics = [#tpu.dimension_semantics<parallel>, #tpu.dimension_semantics<parallel>, #tpu.dimension_semantics<arbitrary>], iteration_bounds = array<i64: 2, 1, 1>, scalar_prefetch = 0 : i64, scratch_operands = 0 : i64, tpu.core_type = #tpu.core_type<tc>, window_params = [{transform_indices = @transform_0, window_bounds = array<i64: 1, 192, 128>}, {transform_indices = @transform_1, window_bounds = array<i64: 1, 32, 192>}, {transform_indices = @transform_2, window_bounds = array<i64: 1, 32, 1>}, {transform_indices = @transform_3, window_bounds = array<i64: 1, 32, 128>}]} {
    %c0_i32 = arith.constant 0 : i32
    %0 = arith.cmpi eq, %arg2, %c0_i32 : i32
    %1 = arith.extui %0 : i1 to i32
    %c0_i32_0 = arith.constant 0 : i32
    %2 = arith.cmpi ne, %1, %c0_i32_0 : i32
    scf.if %2 {
      %cst_14 = arith.constant 0.000000e+00 : f32
      %17 = vector.broadcast %cst_14 : f32 to vector<32x128xf32>
      %c0_15 = arith.constant 0 : index
      %c0_16 = arith.constant 0 : index
      %c0_17 = arith.constant 0 : index
      %18 = vector.load %arg6[%c0_15, %c0_16, %c0_17] : memref<1x32x128xf32, #tpu.memory_space<vmem>>, vector<1x32x128xf32>
      %19 = vector.shape_cast %18 : vector<1x32x128xf32> to vector<32x128xf32>
      %20 = vector.shape_cast %17 : vector<32x128xf32> to vector<1x32x128xf32>
      tpu.vector_store %arg6[%c0_15, %c0_16, %c0_17], %20 {strides = array<i32>} : memref<1x32x128xf32, #tpu.memory_space<vmem>>, vector<1x32x128xf32>,
    } else {
    }
    %c0 = arith.constant 0 : index
    %c0_1 = arith.constant 0 : index
    %c0_2 = arith.constant 0 : index
    %3 = vector.load %arg6[%c0, %c0_1, %c0_2] : memref<1x32x128xf32, #tpu.memory_space<vmem>>, vector<1x32x128xf32>
    %4 = vector.shape_cast %3 : vector<1x32x128xf32> to vector<32x128xf32>
    %c0_3 = arith.constant 0 : index
    %c0_4 = arith.constant 0 : index
    %c0_5 = arith.constant 0 : index
    %5 = vector.load %arg4[%c0_3, %c0_4, %c0_5] : memref<1x32x192xbf16, #tpu.memory_space<vmem>>, vector<1x32x192xbf16>
    %6 = vector.shape_cast %5 : vector<1x32x192xbf16> to vector<32x192xbf16>
    %c0_6 = arith.constant 0 : index
    %c0_7 = arith.constant 0 : index
    %c0_8 = arith.constant 0 : index
    %7 = vector.load %arg3[%c0_6, %c0_7, %c0_8] : memref<1x192x128xbf16, #tpu.memory_space<vmem>>, vector<1x192x128xbf16>
    %8 = vector.shape_cast %7 : vector<1x192x128xbf16> to vector<192x128xbf16>
    %cst = arith.constant dense<0.000000e+00> : vector<32x128xf32>
    %9 = tpu.matmul %6, %8, %cst {dimension_numbers = #tpu.dot_dimension_numbers<[1], [0], [0], [1], [0, 0, 1, 1], [], []>} : vector<32x192xbf16>, vector<192x128xbf16>, vector<32x128xf32> -> vector<32x128xf32>
    %10 = arith.addf %4, %9 : vector<32x128xf32>
    %c0_9 = arith.constant 0 : index
    %c0_10 = arith.constant 0 : index
    %c0_11 = arith.constant 0 : index
    %11 = vector.load %arg6[%c0_9, %c0_10, %c0_11] : memref<1x32x128xf32, #tpu.memory_space<vmem>>, vector<1x32x128xf32>
    %12 = vector.shape_cast %11 : vector<1x32x128xf32> to vector<32x128xf32>
    %13 = vector.shape_cast %10 : vector<32x128xf32> to vector<1x32x128xf32>
    tpu.vector_store %arg6[%c0_9, %c0_10, %c0_11], %13 {strides = array<i32>} : memref<1x32x128xf32, #tpu.memory_space<vmem>>, vector<1x32x128xf32>,
    %c0_i32_12 = arith.constant 0 : i32
    %14 = arith.cmpi eq, %arg2, %c0_i32_12 : i32
    %15 = arith.extui %14 : i1 to i32
    %c0_i32_13 = arith.constant 0 : i32
    %16 = arith.cmpi ne, %15, %c0_i32_13 : i32
    scf.if %16 {
      %c0_14 = arith.constant 0 : index
      %c0_15 = arith.constant 0 : index
      %c0_16 = arith.constant 0 : index
      %17 = vector.load %arg6[%c0_14, %c0_15, %c0_16] : memref<1x32x128xf32, #tpu.memory_space<vmem>>, vector<1x32x128xf32>
      %18 = vector.shape_cast %17 : vector<1x32x128xf32> to vector<32x128xf32>
      %c0_17 = arith.constant 0 : index
      %c0_18 = arith.constant 0 : index
      %c0_19 = arith.constant 0 : index
      %19 = vector.load %arg5[%c0_17, %c0_18, %c0_19] : memref<1x32x1xf32, #tpu.memory_space<vmem>>, vector<1x32x1xf32>
      %20 = vector.shape_cast %19 : vector<1x32x1xf32> to vector<32x1xf32>
      %21 = vector.broadcast %20 : vector<32x1xf32> to vector<32x128xf32>
      %22 = arith.mulf %18, %21 : vector<32x128xf32>
      %c0_20 = arith.constant 0 : index
      %c0_21 = arith.constant 0 : index
      %c0_22 = arith.constant 0 : index
      %23 = vector.load %arg6[%c0_20, %c0_21, %c0_22] : memref<1x32x128xf32, #tpu.memory_space<vmem>>, vector<1x32x128xf32>
      %24 = vector.shape_cast %23 : vector<1x32x128xf32> to vector<32x128xf32>
      %25 = vector.shape_cast %22 : vector<32x128xf32> to vector<1x32x128xf32>
      tpu.vector_store %arg6[%c0_20, %c0_21, %c0_22], %25 {strides = array<i32>} : memref<1x32x128xf32, #tpu.memory_space<vmem>>, vector<1x32x128xf32>,
    } else {
    }
    return
  }
  func.func @transform_0(%arg0: i32, %arg1: i32, %arg2: i32) -> (i32, i32, i32) {
    %c0_i32 = arith.constant 0 : i32
    return %arg0, %arg2, %arg1 : i32, i32, i32
  }
  func.func @transform_1(%arg0: i32, %arg1: i32, %arg2: i32) -> (i32, i32, i32) {
    %c0_i32 = arith.constant 0 : i32
    %c0_i32_0 = arith.constant 0 : i32
    return %arg0, %c0_i32, %arg2 : i32, i32, i32
  }
  func.func @transform_2(%arg0: i32, %arg1: i32, %arg2: i32) -> (i32, i32, i32) {
    %c0_i32 = arith.constant 0 : i32
    %c0_i32_0 = arith.constant 0 : i32
    %c0_i32_1 = arith.constant 0 : i32
    return %arg0, %c0_i32, %c0_i32_0 : i32, i32, i32
  }
  func.func @transform_3(%arg0: i32, %arg1: i32, %arg2: i32) -> (i32, i32, i32) {
    %c0_i32 = arith.constant 0 : i32
    %c0_i32_0 = arith.constant 0 : i32
    return %arg0, %c0_i32, %arg1 : i32, i32, i32
  }
}

</mosaic_0001>

<bundles_post_ra>
// kernel: tpu_custom_call.1
= control target key start
LH: loop header
LB: loop body
LE: loop exit
PB: predicated region body
PF: predicated region fallthrough
CT: control target
= control target key end

     0   :  { %8 = vsyncpa [#allocation3], 0  ;;  %s1133_s0 = inlined_call_operand.hbm [shape: bf16[2,192,128], index: 0, kind: input, shape index: {}]   ;;  %s1134_s1 = inlined_call_operand.vmem [shape: bf16[2,32,192], index: 1, kind: input, shape index: {}]   ;;  %s1135_s2 = inlined_call_operand.vmem [shape: f32[2,32,1], index: 2, kind: input, shape index: {}]   ;;  %s1136_s3 = inlined_call_operand.hbm [shape: f32[2,32,128], index: 3, kind: output, shape index: {}]  }
   0x1   :  { %10 = vsyncpa [#allocation3 + $0x1], 0 }
   0x2   :  { %11 = vsyncpa [#allocation4], 0 }
   0x3   :  { %13 = vsyncpa [#allocation4 + $0x1], 0  ;;  %s932_s12 = smov 0   ;;  %s934_s13 = smov 0  }
   0x4   :  { %s936_s14 = smov 0   ;;  %s938_s15 = smov 0  }
   0x5   :  { %s940_s16 = smov 0   ;;  %s942_s17 = smov 0  }
   0x6 LB: > { %s643_s18 = sadd.s32 4294967295, %s903_s17   ;;  %s644_s19 = sadd.s32 4294967294, %s903_s17   ;;  %s903_s17 = sphi %s942_s17, %s19_s17   ;;  %s899_s16 = sphi %s940_s16, %s1147_s16   ;;  %s895_s15 = sphi %s938_s15, %s1146_s15   ;;  %s891_s14 = sphi %s936_s14, %s1145_s14   ;;  %s887_s13 = sphi %s934_s13, %s1144_s13   ;;  %s883_s12 = sphi %s932_s12, %s1143_s12  }
   0x7   : > { %s38_s20 = sadd.s32 1, %s899_s16  ;;  %s49_s21 = sadd.s32 1, %s891_s14 }
   0x8   : > { %p40_p0 = scmp.ge.s32.totalorder %s38_s20, 2  ;;  %p56_p1 = scmp.ne.s32.totalorder %s891_s14, %s887_s13 }
   0x9   : > { %p57_p2 = scmp.eq.s32.totalorder %s903_s17, 0  ;;  %p62_p3 = scmp.ne.s32.totalorder %s887_s13, %s883_s12 }
   0xa   : > { %s1149_s20 = smov (%p40_p0, %s38_s20), 0  ;;  %p63_p5 = scmp.eq.s32.totalorder %s643_s18, 0 }
   0xb   : > { %p973_p4 = por %p57_p2, %p56_p1  ;;  %s42_s23 = ssub.s32 %s899_s16, %s1149_s20 }
   0xc   : > { %p142_p6 = scmp.eq.s32.totalorder %s643_s18, 1  ;;  %p47_p7 = scmp.eq.s32.totalorder %s42_s23, 0 }
   0xd   : > { %p979_p8 = por %p63_p5, %p62_p3  ;;  %p148_p10 = scmp.eq.s32.totalorder %s644_s19, 1 }
   0xe   : > { %p983_p9 = por %p142_p6, %p56_p1  ;;  %p719_p13 = scmp.lt.s32.totalorder %s903_s17, 2 }
   0xf   : > { %s988_s26 = scalar_select %p47_p7, %s891_s14, %s49_s21  }
  0x10   : > { %p990_p11 = por %p148_p10, %p62_p3  ;;  %s168_s28 = sand.u32 1, %s891_s14  }
  0x11   : > { %s704_s29 = smul.u32 96, %s168_s28  ;;  %p1000_p0 = pnand %p719_p13, %p973_p4 }
  0x12   : > { %s705_s30 = smul.u32 1536, %s899_s16  ;;  %p648_p1 = scmp.ge.s32.totalorder %s903_s17, 1 }
  0x13   : > { %s172_s8 = scalar_lea.vmem [#allocation2], %s704_s29  ;;  %s169_s10 = scalar_lea.sflag [#allocation3], %s168_s28 }
  0x14   : > { %s181_s7 = scalar_lea.hbm %s1133_s0, %s705_s30  ;;  %s182_s9 = sshll.u32 %s172_s8, 4  ;;  %s183_s9 = int_to_ptr.vmem [resolvable:$true] %s182_s9 }
  0x15   : > { %p797_p2 = pneg %p1000_p0  ;;  %s808_s11 = scalar_lea.vmem %s183_s9, 1536 }
  0x16   : > { %p809_p3 = scmp.ne.s32.totalorder %s183_s9, %s808_s11  ;;  %s905_s18 = smov [#allocation2]  }
  0x17   : > { %s813_s19 = sshll.u32 %s905_s18, 4  ;;  %s814_s19 = int_to_ptr.vmem [resolvable:$false] %s813_s19 }
  0x18   : > { %p811_p5 = pnand %p809_p3, %p797_p2  ;;  %s815_s21 = scalar_lea.vmem %s814_s19, 3072 }
  0x19   : > { %p816_p4 = scmp.lt.s32.totalorder %s183_s9, %s814_s19  ;;  %p817_p7 = scmp.lt.s32.totalorder %s815_s21, %s808_s11 }
  0x1a   : > { %p812_p6 = pneg %p811_p5 }
  0x1b   : > { %p818_p10 = por %p817_p7, %p816_p4 }
  0x1d   : > { %p819_p13 = pnand %p818_p10, %p812_p6 }
  0x1f   : > { %822 = shalt.err (!%p819_p13)
}
  0x20   : > { %s906_s22 = smov 64   ;;  %s907_s23 = smov 4  }
  0x21   : > { %714 = dma.hbm_to_vmem [thread:$0]  (!%p1000_p0), %s181_s7, 1536, %s183_s9, %s169_s10, %s906_s22, %s906_s22, %s907_s23  }
  0x22   : > { %p211_p12 = scmp.lt.s32.totalorder %s903_s17, 3 }
  0x24   : > { %p212_p2 = pnand %p648_p1, %p211_p12 }
  0x25   : > { %s1016_s28 = sand.u32 (!%p212_p2), 1, %s887_s13  }
  0x26   : > { %215 = sbr.rel (%p212_p2) target bundleno = 307 (0x133), region = 32  ;;  %s218_s30 = scalar_lea.sflag (!%p212_p2), [#allocation3], %s1016_s28 }
  0x27   : > { %s706_s29 = smul.u32 (!%p212_p2), 96, %s1016_s28 }
  0x29   : > { %s1020_s5 = scalar_lea.vmem (!%p212_p2), [#allocation2], %s706_s29 }
  0x2b   : > { %874 = dma.done.wait (%p979_p8), %s218_s30, 1536  }
  0x2c   : > { %876 = vsyncadd (%p979_p8), %s218_s30, 4294965760  ;;  %v908_v0 = vmov 0   ;;  %p260_p12 = scmp.lt.s32.totalorder %s895_s15, 1  ;;  %v777_v1 = vld [vmem:[%s1020_s5 + $0x38] sm:$0xff]   ;;  %v778_v2 = vld [vmem:[%s1020_s5 + $0x30] sm:$0xff]   ;;  %vm405_vm0 = vcmask 523264  }
  0x2d   : > { %412 = vmatprep.subr.bf16.mxu0 %v908_v0  ;;  %680 = vmatprep.subr.bf16.mxu1 %v908_v0  ;;  %v779_v3 = vld [vmem:[%s1020_s5 + $0x28] sm:$0xff]   ;;  %v780_v4 = vld [vmem:[%s1020_s5 + $0x20] sm:$0xff]   ;;  %v781_v6 = vld [vmem:[%s1020_s5 + $0x18] sm:$0xff]   ;;  %s649_s18 = sshll.u32 %s1016_s28, 5  ;;  %s679_s19 = sshll.u32 %s895_s15, 9 }
  0x2e   : > { %776 = vset.pattern.permute.xlu1 %v908_v0  ;;  %775 = vset.pattern.permute.xlu0 %v908_v0  ;;  %s261_s24 = scalar_select %p260_p12, %s895_s15, 1  ;;  %v782_v10 = vld [vmem:[%s1020_s5 + $0x10] sm:$0xff]   ;;  %v783_v13 = vld [vmem:[%s1020_s5 + $0x8] sm:$0xff]   ;;  %v784_v14 = vld [vmem:[%s1020_s5] sm:$0xff]  }
  0x2f   : > { %413 = vmatpush1.bf16.msra.mxu0 %v777_v1  ;;  %692 = vmatpush1.bf16.msra.mxu1 %v777_v1  ;;  %v785_v15 = vld [vmem:[%s1020_s5 + $0x58] sm:$0xff]   ;;  %v786_v16 = vld [vmem:[%s1020_s5 + $0x50] sm:$0xff]   ;;  %v787_v17 = vld [vmem:[%s1020_s5 + $0x48] sm:$0xff]   ;;  %s257_s21 = scalar_lea.vmem [#allocation5], %s649_s18  ;;  %s1083_s30 = scalar_lea.hbm %s1136_s3, %s679_s19 }
  0x30   : > { %414 = vmatprep.subr.bf16.mxu0 %v908_v0  ;;  %681 = vmatprep.subr.bf16.mxu1 %v908_v0  ;;  %s677_s4 = sshll.u32 %s261_s24, 5  ;;  %v788_v18 = vld [vmem:[%s1020_s5 + $0x40] sm:$0xff]   ;;  %s523_s22 = sshll.u32 %s257_s21, 4  ;;  %s1085_s22 = int_to_ptr.vmem [resolvable:$true] %s523_s22 }
  0x31   : > { %s1043_s8 = scalar_lea.vmem %s1134_s1, %s677_s4  ;;  %s273_s11 = scalar_lea.vmem %s1135_s2, %s677_s4 }
  0x32   : > { %v791_v5 = vld [vmem:[%s1043_s8 + $0x4] ss:$8 sps:$4 sm:$0xff]   ;;  %v794_v7 = vld [vmem:[%s1043_s8 + $0x14] ss:$8 sps:$4 sm:$0xff]   ;;  %v789_v19 = vld [vmem:[%s1043_s8] ss:$8 sps:$4 sm:$0xff]  }
  0x33   : > { %415 = vmatpush1.bf16.msra.mxu0 %v778_v2  ;;  %693 = vmatpush1.bf16.msra.mxu1 %v778_v2  ;;  %v478_v8 = vld [vmem:[%s273_s11 + $0x10] sm:$0xff]  ;;  %v476_v9 = vld [vmem:[%s273_s11] sm:$0xff]  ;;  %v479_v11 = vld [vmem:[%s273_s11 + $0x18] sm:$0xff]  ;;  %s509_s15 = scalar_lea.sflag [#allocation4], %s1016_s28  ;;  %s823_s5 = scalar_lea.vmem %s1085_s22, 512 }
  0x34   : > { %416 = vmatprep.subr.bf16.mxu0 %v908_v0  ;;  %682 = vmatprep.subr.bf16.mxu1 %v908_v0  ;;  %v477_v12 = vld [vmem:[%s273_s11 + $0x8] sm:$0xff]  ;;  %v792_v20 = vld [vmem:[%s1043_s8 + $0x10] ss:$8 sps:$4 sm:$0xff]   ;;  %p824_p8 = scmp.ne.s32.totalorder %s1085_s22, %s823_s5  ;;  %s909_s24 = smov [#allocation5]  }
  0x35   : > { %670 = vmatprep.mubr.msk.bf16.mxu0 %vm405_vm0, %v791_v5  ;;  %671 = vmatprep.mubr.msk.bf16.mxu1 %vm405_vm0, %v794_v7  ;;  %s827_s4 = sshll.u32 %s909_s24, 4  ;;  %s828_s4 = int_to_ptr.vmem [resolvable:$false] %s827_s4 }
  0x36   : > { %492 = vperm.xlu1 %776, %v478_v8   ;;  %482 = vperm.xlu0 %775, %v476_v9   ;;  %p825_p0 = pnand %p824_p8, %p983_p9  ;;  %s829_s6 = scalar_lea.vmem %s828_s4, 1024 }
  0x37   : > { %417 = vmatpush1.bf16.msra.mxu0 %v779_v3  ;;  %694 = vmatpush1.bf16.msra.mxu1 %v779_v3  ;;  %p830_p3 = scmp.lt.s32.totalorder %s1085_s22, %s828_s4  ;;  %p831_p5 = scmp.lt.s32.totalorder %s829_s6, %s823_s5 }
  0x38   : > { %418 = vmatprep.subr.bf16.mxu0 %v908_v0  ;;  %683 = vmatprep.subr.bf16.mxu1 %v908_v0  ;;  %p826_p1 = pneg %p825_p0 }
  0x39   : > { %p832_p6 = por %p831_p5, %p830_p3 }
  0x3a   : > { %497 = vperm.xlu1 %776, %v479_v11   ;;  %487 = vperm.xlu0 %775, %v477_v12  }
  0x3b   : > { %419 = vmatpush1.bf16.msra.mxu0 %v780_v4  ;;  %695 = vmatpush1.bf16.msra.mxu1 %v780_v4  ;;  %p833_p4 = pnand %p832_p6, %p826_p1 }
  0x3c   : > { %420 = vmatprep.subr.bf16.mxu0 %v908_v0  ;;  %684 = vmatprep.subr.bf16.mxu1 %v908_v0 }
  0x3f   : > { %421 = vmatpush1.bf16.msra.mxu0 %v781_v6  ;;  %696 = vmatpush1.bf16.msra.mxu1 %v781_v6 }
  0x40   : > { %422 = vmatprep.subr.bf16.mxu0 %v908_v0  ;;  %685 = vmatprep.subr.bf16.mxu1 %v908_v0 }
  0x43   : > { %423 = vmatpush1.bf16.msra.mxu0 %v782_v10  ;;  %697 = vmatpush1.bf16.msra.mxu1 %v782_v10 }
  0x44   : > { %424 = vmatprep.subr.bf16.mxu0 %v908_v0  ;;  %686 = vmatprep.subr.bf16.mxu1 %v908_v0 }
  0x47   : > { %425 = vmatpush1.bf16.msra.mxu0 %v783_v13  ;;  %698 = vmatpush1.bf16.msra.mxu1 %v783_v13 }
  0x48   : > { %426 = vmatprep.subr.bf16.mxu0 %v908_v0  ;;  %687 = vmatprep.subr.bf16.mxu1 %v908_v0 }
  0x4b   : > { %427 = vmatpush1.bf16.msra.mxu0 %v784_v14  ;;  %699 = vmatpush1.bf16.msra.mxu1 %v784_v14 }
  0x4c   : > { %436 = vmatprep.subr.bf16.mxu0 %v908_v0  ;;  %688 = vmatprep.subr.bf16.mxu1 %v908_v0 }
  0x4f   : > { %437 = vmatpush2.bf16.msra.mxu0 %v785_v15  ;;  %700 = vmatpush2.bf16.msra.mxu1 %v785_v15 }
  0x50   : > { %438 = vmatprep.subr.bf16.mxu0 %v908_v0  ;;  %689 = vmatprep.subr.bf16.mxu1 %v908_v0 }
  0x53   : > { %439 = vmatpush2.bf16.msra.mxu0 %v786_v16  ;;  %701 = vmatpush2.bf16.msra.mxu1 %v786_v16 }
  0x54   : > { %440 = vmatprep.subr.bf16.mxu0 %v908_v0  ;;  %690 = vmatprep.subr.bf16.mxu1 %v908_v0 }
  0x57   : > { %441 = vmatpush2.bf16.msra.mxu0 %v787_v17  ;;  %702 = vmatpush2.bf16.msra.mxu1 %v787_v17 }
  0x58   : > { %442 = vmatprep.subr.bf16.mxu0 %v908_v0  ;;  %691 = vmatprep.subr.bf16.mxu1 %v908_v0 }
  0x5b   : > { %443 = vmatpush2.bf16.msra.mxu0 %v788_v18  ;;  %703 = vmatpush2.bf16.msra.mxu1 %v788_v18 }
  0x5e   : > { %445 = vmatmul.mubr.bf16.vlgmr.msra.gmra.mxu0 %v789_v19  ;;  %453 = vmatmul.mubr.bf16.vlgmr.msra.gmra.mxu1 %v792_v20 }
  0xb1   : > { %v493_v21 = vpop.permute.xlu1 %492  ;;  %v483_v22 = vpop.permute.xlu0 %482 }
  0xb5   : > { %v498_v31 = vpop.permute.xlu1 %497  ;;  %v488_v32 = vpop.permute.xlu0 %487 }
 0x11e   : > { %v446_v23 = vpop.f32.mrf.mxu0  ;;  %v454_v24 = vpop.f32.mrf.mxu1 }
 0x11f   : > { %v502_v27 = vmul.f32 %v493_v21, %v454_v24  ;;  %v500_v28 = vmul.f32 %v483_v22, %v446_v23 }
 0x120   : > { %v448_v25 = vpop.f32.mrf.mxu0  ;;  %v456_v26 = vpop.f32.mrf.mxu1 }
 0x121   : > { %506 = vst [vmem:[%s257_s21 + $0x10] sm:$0xff] %v502_v27  ;;  %504 = vst [vmem:[%s257_s21] sm:$0xff] %v500_v28 }
 0x122   : > { %v449_v29 = vpop.f32.mrf.mxu0  ;;  %v457_v30 = vpop.f32.mrf.mxu1 }
 0x123   : > { %v503_v35 = vmul.f32 %v498_v31, %v457_v30  ;;  %v501_v36 = vmul.f32 %v488_v32, %v449_v29 }
 0x124   : > { %v451_v33 = vpop.f32.mrf.mxu0  ;;  %v459_v34 = vpop.f32.mrf.mxu1 }
 0x125   : > { %507 = vst [vmem:[%s257_s21 + $0x18] sm:$0xff] %v503_v35  ;;  %505 = vst [vmem:[%s257_s21 + $0x8] sm:$0xff] %v501_v36 }
 0x126   : > { %836 = shalt.err (!%p833_p4)
}
 0x127   : > { %s837_s7 = scalar_lea.hbm %s1083_s30, 512  ;;  %s841_s10 = scalar_lea.hbm %s1136_s3, 1024 }
 0x128   : > { %p838_p7 = scmp.ne.s32.totalorder %s1083_s30, %s837_s7  ;;  %p842_p2 = scmp.lt.s32.totalorder %s1083_s30, %s1136_s3 }
 0x129   : > { %p843_p12 = scmp.lt.s32.totalorder %s841_s10, %s837_s7 }
 0x12a   : > { %p839_p10 = pnand %p838_p7, %p983_p9 }
 0x12b   : > { %p844_p8 = por %p843_p12, %p842_p2 }
 0x12c   : > { %p840_p13 = pneg %p839_p10 }
 0x12e   : > { %p845_p0 = pnand %p844_p8, %p840_p13 }
 0x130   : > { %848 = shalt.err (!%p845_p0)
}
 0x131   : > { %s910_s19 = smov 128   ;;  %s911_s21 = smov 8  }
 0x132   : > { %709 = dma.vmem_to_hbm [thread:$0]  (%p983_p9), %s1085_s22, 512, %s1083_s30, %s509_s15, %s910_s19, %s910_s19, %s911_s21  }
 0x133 PF: > { %s538_s23 = sand.u32 1, %s883_s12   ;;  %p1142_p1 = scmp.ge.s32.totalorder %s903_s17, 2 }
 0x134   : > { %s539_s29 = scalar_lea.sflag [#allocation4], %s538_s23 }
 0x135   : > { %p716_p3 = pnand %p1142_p1, %p990_p11 }
 0x137   : > { %p717_p5 = pneg %p716_p3 }
 0x139   : > { %878 = dma.done.wait (%p717_p5), %s539_s29, 512  }
 0x13a   : > { %880 = vsyncadd (%p717_p5), %s539_s29, 4294966784  ;;  %s19_s17 = sadd.s32 1, %s903_s17   ;;  %s1143_s12 = smov %s887_s13 }
 0x13b   : > { %p16_p6 = scmp.ge.s32.totalorder %s19_s17, 4   ;;  %s1144_s13 = smov %s891_s14 }
 0x13c   : > { %s1145_s14 = smov %s988_s26  ;;  %s1146_s15 = smov %s899_s16 }
 0x13d   : > { %s1147_s16 = smov %s1149_s20  ;;  %18 = sbr.rel (!%p16_p6) target bundleno = 6 (0x6), region = 91 }
 0x142   :  { %544 = vsyncpa [#allocation3], 1 }
 0x143   :  { %546 = vsyncpa [#allocation3 + $0x1], 1 }
 0x144   :  { %547 = vsyncpa [#allocation4], 1 }
 0x145   :  { %549 = vsyncpa [#allocation4 + $0x1], 1 }

</bundles_post_ra>
